<compile_context>
chip_gen: v7x
topology: tpu7x:2x2x1
jax: 0.10.0
libtpu: 0.0.40
codegen_flags: <defaults>
</compile_context>

<pallas_src>
import math

import jax
import jax.numpy as jnp
from jax.experimental import pallas as pl
from jax.experimental.pallas import tpu as pltpu
import numpy as np


# --------------------------------------------------------------------------
# Kernels
# --------------------------------------------------------------------------

def _stats_kernel(x_ref, sum_ref, sq_ref, acc_s_ref, acc_q_ref):
    """Accumulate per-lane sum / sum-of-squares over the batch grid axis.

    Hot loop stays on the VALU: row groups of `sub` sublanes are added into a
    resident (sub, lc) f32 scratch; the cross-sublane fold to (1, lc) runs only
    once, on the last batch tile, before the single HBM writeback.
    """
    bb, lc = x_ref.shape
    sub = acc_s_ref.shape[0]

    @pl.when(pl.program_id(1) == 0)
    def _init():
        acc_s_ref[...] = jnp.zeros_like(acc_s_ref)
        acc_q_ref[...] = jnp.zeros_like(acc_q_ref)

    x = x_ref[...].astype(jnp.float32)                 # (bb, lc)
    xs = x.reshape(bb // sub, sub, lc)                 # leading-axis split: free
    acc_s_ref[...] += jnp.sum(xs, axis=0)              # VALU adds of (sub, lc)
    acc_q_ref[...] += jnp.sum(xs * xs, axis=0)

    @pl.when(pl.program_id(1) == pl.num_programs(1) - 1)
    def _finalize():                                   # one XLU fold per lane group
        sum_ref[...] = jnp.sum(acc_s_ref[...], axis=0, keepdims=True)
        sq_ref[...] = jnp.sum(acc_q_ref[...], axis=0, keepdims=True)


def _norm_kernel(x_ref, scale_ref, shift_ref, out_ref):
    """out = x * scale + shift  (per-lane scale/shift broadcast over rows)."""
    x = x_ref[...].astype(jnp.float32)
    out_ref[...] = (x * scale_ref[...] + shift_ref[...]).astype(out_ref.dtype)


# --------------------------------------------------------------------------
# Tiling helpers
# --------------------------------------------------------------------------

def _lane_tile(L, min_lanes=1024, max_lanes=8192):
    """Lane-tile width: a divisor of L that is a multiple of 128, preferring
    ~1-8K lanes and >=2 lane groups (so the 'parallel' lane axis can shard
    across both TensorCores on v7x). Falls back to the full extent (always a
    legal block shape) when L is not 128-aligned."""
    if L % 128 != 0:
        # TODO(synk): for unaligned, very large L combined with the minimum
        # batch tile this block could exceed the target size; acceptable for
        # normalization-scale activations.
        return L
    divs = [d for d in range(128, L + 1, 128) if L % d == 0]

    def pick(cands):
        in_range = [d for d in cands if min_lanes <= d <= max_lanes]
        if in_range:
            return max(in_range)
        under = [d for d in cands if d < min_lanes]
        if under:
            return max(under)
        return None

    multi = [d for d in divs if d < L]          # leaves >= 2 lane groups
    for cands in (multi, divs):
        got = pick(cands)
        if got is not None:
            return got
    return L


def _batch_tile(B, lane_bytes, sublane, target_bytes):
    """Rows per block: a multiple of the sublane granule dividing B (or B
    itself), targeting ~target_bytes x-blocks."""
    legal = [d for d in range(sublane, B + 1, sublane) if B % d == 0]
    legal.append(B)
    fitting = [d for d in legal if d * lane_bytes <= target_bytes]
    return max(fitting) if fitting else min(legal)


def _vmem_capacity_bytes():
    """Generation-aware VMEM capacity (64 MiB/TC on v7x, 128 MiB v5e/v6e)."""
    try:
        info = pltpu.get_tpu_info()
        for attr in ("vmem_capacity_bytes", "vmem_bytes", "vmem_size_bytes"):
            v = getattr(info, attr, None)
            if v:
                return int(v)
    except Exception:
        pass
    return 64 << 20  # conservative default (v7x per-TC)


def _vmem_limit(bb, lc, sub, in_itemsize, out_itemsize, vmem_cap):
    """Scoped-VMEM budget derived from the chosen tiles (+ headroom), capped
    by the chip's VMEM capacity minus ~8 MiB slack."""
    def padded(rows, lanes, isz):
        sgr = max(1, 32 // (isz * 8)) * 8       # 8 (f32) / 16 (bf16) / 32 (i8)
        return (-(-rows // sgr) * sgr) * (-(-lanes // 128) * 128) * isz

    x_tile = padded(bb, lc, in_itemsize)
    o_tile = padded(bb, lc, out_itemsize)
    row = padded(1, lc, 4)
    acc = padded(sub, lc, 4)
    need = 2 * x_tile + 2 * o_tile + 2 * acc + 8 * row + (4 << 20)
    cap = max(32 << 20, vmem_cap - (8 << 20))
    return int(min(cap, max(32 << 20, need)))


# --------------------------------------------------------------------------
# Pallas wrappers
# --------------------------------------------------------------------------

def _lane_stats_pallas(x2d, bb, lc, sub, vmem_limit):
    """Per-lane sum and sum-of-squares reduced over the batch axis."""
    B, L = x2d.shape
    grid = (L // lc, B // bb)  # (lane groups [parallel], batch tiles [reduction])
    itemsize = jnp.dtype(x2d.dtype).itemsize
    cost = pl.CostEstimate(
        flops=3 * B * L,
        transcendentals=0,
        bytes_accessed=B * L * itemsize + 2 * L * 4)
    return pl.pallas_call(
        _stats_kernel,
        out_shape=(
            jax.ShapeDtypeStruct((1, L), jnp.float32),
            jax.ShapeDtypeStruct((1, L), jnp.float32),
        ),
        grid_spec=pltpu.PrefetchScalarGridSpec(
            num_scalar_prefetch=0,
            grid=grid,
            in_specs=[pl.BlockSpec((bb, lc), lambda g, b: (b, g))],
            out_specs=[
                pl.BlockSpec((1, lc), lambda g, b: (0, g)),
                pl.BlockSpec((1, lc), lambda g, b: (0, g)),
            ],
            scratch_shapes=[
                pltpu.VMEM((sub, lc), jnp.float32),
                pltpu.VMEM((sub, lc), jnp.float32),
            ],
        ),
        compiler_params=pltpu.CompilerParams(
            dimension_semantics=("parallel", "arbitrary"),
            vmem_limit_bytes=vmem_limit),
        cost_estimate=cost,
    )(x2d)


def _apply_norm_pallas(x2d, scale_lane, shift_lane, bb, lc, vmem_limit,
                       donate_x=False):
    """out[b, l] = x[b, l] * scale[l] + shift[l] via a lane-dense Pallas FMA."""
    B, L = x2d.shape
    grid = (L // lc, B // bb)
    itemsize = jnp.dtype(x2d.dtype).itemsize
    cost = pl.CostEstimate(
        flops=2 * B * L,
        transcendentals=0,
        bytes_accessed=2 * B * L * itemsize + 2 * L * 4)
    return pl.pallas_call(
        _norm_kernel,
        out_shape=jax.ShapeDtypeStruct((B, L), x2d.dtype),
        grid_spec=pltpu.PrefetchScalarGridSpec(
            num_scalar_prefetch=0,
            grid=grid,
            in_specs=[
                pl.BlockSpec((bb, lc), lambda g, b: (b, g)),
                pl.BlockSpec((1, lc), lambda g, b: (0, g)),
                pl.BlockSpec((1, lc), lambda g, b: (0, g)),
            ],
            out_specs=pl.BlockSpec((bb, lc), lambda g, b: (b, g)),
        ),
        compiler_params=pltpu.CompilerParams(
            dimension_semantics=("parallel", "parallel"),
            vmem_limit_bytes=vmem_limit),
        cost_estimate=cost,
        # Alias x -> out only when the caller promises not to reuse x.
        input_output_aliases=({0: 0} if donate_x else {}),
    )(x2d, scale_lane, shift_lane)


# --------------------------------------------------------------------------
# Module forward
# --------------------------------------------------------------------------

def tnorm_forward(x, gamma, beta, running_mean, running_var,
                  momentum=0.1, training=True, track_running_stats=True,
                  eps=1e-5, donate_x=False, block_target_bytes=None):
    """x: (B, C, N, T); gamma/beta/running_*: (1, C, N, 1).
    Returns (out, new_running_mean, new_running_var)."""
    B, C, N, T = x.shape
    L = C * N * T

    if not track_running_stats:
        # TODO(synk): per-sample branch (mean/var over time axis only, unbiased
        # as in the module) kept in plain JAX; it is a tiny per-row reduction.
        mean = jnp.mean(x, axis=3, keepdims=True)
        var = jnp.var(x, axis=3, keepdims=True, ddof=1)
        out = (x - mean) / jnp.sqrt(var + eps) * gamma + beta
        return out, running_mean, running_var

    # Lane-dense layout: merge trailing dims (no HBM traffic).
    x2d = x.reshape(B, L)
    itemsize = jnp.dtype(x.dtype).itemsize
    sublane = max(1, 32 // (itemsize * 8)) * 8
    vmem_cap = _vmem_capacity_bytes()
    if block_target_bytes is None:
        block_target_bytes = min(8 << 20, vmem_cap // 8)

    lc = _lane_tile(L)
    bb = _batch_tile(B, lc * itemsize, sublane, block_target_bytes)
    sub = math.gcd(bb, 8)                      # sublane group for the VALU accum
    vmem_limit = _vmem_limit(bb, lc, sub, itemsize, itemsize, vmem_cap)

    gamma_cn = gamma.reshape(C, N).astype(jnp.float32)
    beta_cn = beta.reshape(C, N).astype(jnp.float32)

    if training:
        # Pass 1 (Pallas): per-lane sum / sum-of-squares over the batch tiles.
        sum_lane, sq_lane = _lane_stats_pallas(x2d, bb, lc, sub, vmem_limit)

        # Tiny finalize on C*N values: fold the T lanes of each (c, n) group;
        # biased variance via E[x^2] - mean^2 with f32 accumulators.
        # TODO(synk): single-sweep variance can cancel when |mean| >> std; keep
        # the clamp (and f32 sums) — fine for normalization-scale activations.
        cnt = float(B * T)
        sum_cn = sum_lane.reshape(C, N, T).sum(axis=2)
        sq_cn = sq_lane.reshape(C, N, T).sum(axis=2)
        mean_cn = sum_cn / cnt
        var_cn = jnp.maximum(sq_cn / cnt - mean_cn * mean_cn, 0.0)

        # Running-stats buffer update (PyTorch side effect -> returned arrays).
        # Note: divides by (cnt - 1), exactly like the module (inf if B*T == 1).
        mean_4d = mean_cn.reshape(1, C, N, 1).astype(running_mean.dtype)
        var_4d = var_cn.reshape(1, C, N, 1).astype(running_var.dtype)
        new_rm = momentum * mean_4d + (1.0 - momentum) * running_mean
        new_rv = (momentum * var_4d * cnt / (cnt - 1.0)
                  + (1.0 - momentum) * running_var)
    else:
        # Eval: normalize with the running buffers, no update.
        mean_cn = running_mean.reshape(C, N).astype(jnp.float32)
        var_cn = running_var.reshape(C, N).astype(jnp.float32)
        new_rm, new_rv = running_mean, running_var

    # Fused per-lane scale/shift: out = x * scale + shift (one FMA / element).
    inv_std = 1.0 / jnp.sqrt(var_cn + eps)
    scale_cn = gamma_cn * inv_std
    shift_cn = beta_cn - mean_cn * scale_cn
    scale_lane = jnp.broadcast_to(scale_cn[..., None], (C, N, T)).reshape(1, L)
    shift_lane = jnp.broadcast_to(shift_cn[..., None], (C, N, T)).reshape(1, L)

    # Pass 2 (Pallas): normalize — reads x once more, writes out once.
    out2d = _apply_norm_pallas(x2d, scale_lane, shift_lane, bb, lc,
                               vmem_limit, donate_x=donate_x)
    out = out2d.reshape(B, C, N, T)
    return out, new_rm, new_rv


# --------------------------------------------------------------------------
# Reference + test
# --------------------------------------------------------------------------

def _reference(x, gamma, beta, eps=1e-5):
    mean = jnp.mean(x, axis=(0, 3), keepdims=True)
    var = jnp.var(x, axis=(0, 3), keepdims=True)  # biased
    return (x - mean) / jnp.sqrt(var + eps) * gamma + beta


def _run_case(B, C, N, T, block_target_bytes=None):
    key = jax.random.PRNGKey(0)
    kx, kg, kb = jax.random.split(key, 3)

    x = jax.random.normal(kx, (B, C, N, T), dtype=jnp.float32)
    # Module inits beta=0, gamma=1; perturb deterministically so scale/shift
    # are actually exercised.
    gamma = (jnp.ones((1, C, N, 1), jnp.float32)
             + 0.1 * jax.random.normal(kg, (1, C, N, 1)))
    beta = 0.1 * jax.random.normal(kb, (1, C, N, 1))
    running_mean = jnp.zeros((1, C, N, 1), jnp.float32)
    running_var = jnp.ones((1, C, N, 1), jnp.float32)

    out, new_rm, new_rv = tnorm_forward(
        x, gamma, beta, running_mean, running_var,
        momentum=0.1, training=True, track_running_stats=True,
        block_target_bytes=block_target_bytes)
    jax.block_until_ready(out)
    jax.block_until_ready(new_rm)
    jax.block_until_ready(new_rv)

    # Normalized output check.
    ref = _reference(x, gamma, beta)
    np.testing.assert_allclose(np.asarray(out), np.asarray(ref),
                               rtol=1e-5, atol=1e-5)

    # Running-stats update check (module formula).
    mean_ref = jnp.mean(x, axis=(0, 3), keepdims=True)
    var_ref = jnp.var(x, axis=(0, 3), keepdims=True)
    n = float(B * T)
    rm_ref = 0.1 * mean_ref + 0.9 * running_mean
    rv_ref = 0.1 * var_ref * n / (n - 1.0) + 0.9 * running_var
    np.testing.assert_allclose(np.asarray(new_rm), np.asarray(rm_ref),
                               rtol=1e-5, atol=1e-5)
    np.testing.assert_allclose(np.asarray(new_rv), np.asarray(rv_ref),
                               rtol=1e-5, atol=1e-5)


if __name__ == "__main__":
    # Main small case consistent with the module (B=2, C=4, N=16, T=8).
    _run_case(2, 4, 16, 8)
    # Multi-tile case: a tiny block target forces >=2 batch tiles and >=2 lane
    # groups, exercising the resident init/accumulate/finalize accumulator path.
    _run_case(16, 4, 16, 8, block_target_bytes=4096)
    # Non-128-aligned L: exercises the full-lane-extent fallback block shape.
    _run_case(8, 3, 5, 6)

    print("KERNEL_OK")
</pallas_src>

<mosaic_0001>
module attributes {stable_mosaic.version = 11 : i64} {
  func.func @_stats_kernel(%arg0: i32, %arg1: i32, %arg2: memref<2x256xf32, #tpu.memory_space<vmem>>, %arg3: memref<1x256xf32, #tpu.memory_space<vmem>>, %arg4: memref<1x256xf32, #tpu.memory_space<vmem>>, %arg5: memref<2x256xf32, #tpu.memory_space<vmem>>, %arg6: memref<2x256xf32, #tpu.memory_space<vmem>>) attributes {dimension_semantics = [#tpu.dimension_semantics<parallel>, #tpu.dimension_semantics<arbitrary>], iteration_bounds = array<i64: 2, 1>, scalar_prefetch = 0 : i64, scratch_operands = 2 : i64, tpu.core_type = #tpu.core_type<tc>, window_params = [{transform_indices = @transform_0, window_bounds = array<i64: 2, 256>}, {transform_indices = @transform_1, window_bounds = array<i64: 1, 256>}, {transform_indices = @transform_2, window_bounds = array<i64: 1, 256>}]} {
    %c0_i32 = arith.constant 0 : i32
    %0 = arith.cmpi eq, %arg1, %c0_i32 : i32
    %1 = arith.extui %0 : i1 to i32
    %c0_i32_0 = arith.constant 0 : i32
    %2 = arith.cmpi ne, %1, %c0_i32_0 : i32
    scf.if %2 {
      %cst_13 = arith.constant 0.000000e+00 : f32
      %17 = vector.broadcast %cst_13 : f32 to vector<2x256xf32>
      %c0_14 = arith.constant 0 : index
      %c0_15 = arith.constant 0 : index
      %18 = vector.load %arg5[%c0_14, %c0_15] : memref<2x256xf32, #tpu.memory_space<vmem>>, vector<2x256xf32>
      tpu.vector_store %arg5[%c0_14, %c0_15], %17 {strides = array<i32>} : memref<2x256xf32, #tpu.memory_space<vmem>>, vector<2x256xf32>,
      %cst_16 = arith.constant 0.000000e+00 : f32
      %19 = vector.broadcast %cst_16 : f32 to vector<2x256xf32>
      %c0_17 = arith.constant 0 : index
      %c0_18 = arith.constant 0 : index
      %20 = vector.load %arg6[%c0_17, %c0_18] : memref<2x256xf32, #tpu.memory_space<vmem>>, vector<2x256xf32>
      tpu.vector_store %arg6[%c0_17, %c0_18], %19 {strides = array<i32>} : memref<2x256xf32, #tpu.memory_space<vmem>>, vector<2x256xf32>,
    } else {
    }
    %c0 = arith.constant 0 : index
    %c0_1 = arith.constant 0 : index
    %3 = vector.load %arg2[%c0, %c0_1] : memref<2x256xf32, #tpu.memory_space<vmem>>, vector<2x256xf32>
    %4 = vector.shape_cast %3 : vector<2x256xf32> to vector<1x2x256xf32>
    %c0_2 = arith.constant 0 : index
    %c0_3 = arith.constant 0 : index
    %5 = vector.load %arg5[%c0_2, %c0_3] : memref<2x256xf32, #tpu.memory_space<vmem>>, vector<2x256xf32>
    %cst = arith.constant dense<0.000000e+00> : vector<2x256xf32>
    %6 = vector.multi_reduction <add>, %4, %cst [0] : vector<1x2x256xf32> to vector<2x256xf32>
    %7 = arith.addf %5, %6 : vector<2x256xf32>
    %c0_4 = arith.constant 0 : index
    %c0_5 = arith.constant 0 : index
    %8 = vector.load %arg5[%c0_4, %c0_5] : memref<2x256xf32, #tpu.memory_space<vmem>>, vector<2x256xf32>
    tpu.vector_store %arg5[%c0_4, %c0_5], %7 {strides = array<i32>} : memref<2x256xf32, #tpu.memory_space<vmem>>, vector<2x256xf32>,
    %c0_6 = arith.constant 0 : index
    %c0_7 = arith.constant 0 : index
    %9 = vector.load %arg6[%c0_6, %c0_7] : memref<2x256xf32, #tpu.memory_space<vmem>>, vector<2x256xf32>
    %10 = arith.mulf %4, %4 : vector<1x2x256xf32>
    %cst_8 = arith.constant dense<0.000000e+00> : vector<2x256xf32>
    %11 = vector.multi_reduction <add>, %10, %cst_8 [0] : vector<1x2x256xf32> to vector<2x256xf32>
    %12 = arith.addf %9, %11 : vector<2x256xf32>
    %c0_9 = arith.constant 0 : index
    %c0_10 = arith.constant 0 : index
    %13 = vector.load %arg6[%c0_9, %c0_10] : memref<2x256xf32, #tpu.memory_space<vmem>>, vector<2x256xf32>
    tpu.vector_store %arg6[%c0_9, %c0_10], %12 {strides = array<i32>} : memref<2x256xf32, #tpu.memory_space<vmem>>, vector<2x256xf32>,
    %c0_i32_11 = arith.constant 0 : i32
    %14 = arith.cmpi eq, %arg1, %c0_i32_11 : i32
    %15 = arith.extui %14 : i1 to i32
    %c0_i32_12 = arith.constant 0 : i32
    %16 = arith.cmpi ne, %15, %c0_i32_12 : i32
    scf.if %16 {
      %c0_13 = arith.constant 0 : index
      %c0_14 = arith.constant 0 : index
      %17 = vector.load %arg5[%c0_13, %c0_14] : memref<2x256xf32, #tpu.memory_space<vmem>>, vector<2x256xf32>
      %cst_15 = arith.constant dense<0.000000e+00> : vector<256xf32>
      %18 = vector.multi_reduction <add>, %17, %cst_15 [0] : vector<2x256xf32> to vector<256xf32>
      %19 = vector.shape_cast %18 : vector<256xf32> to vector<1x256xf32>
      %c0_16 = arith.constant 0 : index
      %c0_17 = arith.constant 0 : index
      %20 = vector.load %arg3[%c0_16, %c0_17] : memref<1x256xf32, #tpu.memory_space<vmem>>, vector<1x256xf32>
      tpu.vector_store %arg3[%c0_16, %c0_17], %19 {strides = array<i32>} : memref<1x256xf32, #tpu.memory_space<vmem>>, vector<1x256xf32>,
      %c0_18 = arith.constant 0 : index
      %c0_19 = arith.constant 0 : index
      %21 = vector.load %arg6[%c0_18, %c0_19] : memref<2x256xf32, #tpu.memory_space<vmem>>, vector<2x256xf32>
      %cst_20 = arith.constant dense<0.000000e+00> : vector<256xf32>
      %22 = vector.multi_reduction <add>, %21, %cst_20 [0] : vector<2x256xf32> to vector<256xf32>
      %23 = vector.shape_cast %22 : vector<256xf32> to vector<1x256xf32>
      %c0_21 = arith.constant 0 : index
      %c0_22 = arith.constant 0 : index
      %24 = vector.load %arg4[%c0_21, %c0_22] : memref<1x256xf32, #tpu.memory_space<vmem>>, vector<1x256xf32>
      tpu.vector_store %arg4[%c0_21, %c0_22], %23 {strides = array<i32>} : memref<1x256xf32, #tpu.memory_space<vmem>>, vector<1x256xf32>,
    } else {
    }
    return
  }
  func.func @transform_0(%arg0: i32, %arg1: i32) -> (i32, i32) {
    %c0_i32 = arith.constant 0 : i32
    return %arg1, %arg0 : i32, i32
  }
  func.func @transform_1(%arg0: i32, %arg1: i32) -> (i32, i32) {
    %c0_i32 = arith.constant 0 : i32
    %c0_i32_0 = arith.constant 0 : i32
    return %c0_i32, %arg0 : i32, i32
  }
  func.func @transform_2(%arg0: i32, %arg1: i32) -> (i32, i32) {
    %c0_i32 = arith.constant 0 : i32
    %c0_i32_0 = arith.constant 0 : i32
    return %c0_i32, %arg0 : i32, i32
  }
}

</mosaic_0001>

<bundles_post_ra>
// kernel: tpu_custom_call.1
= control target key start
LH: loop header
LB: loop body
LE: loop exit
PB: predicated region body
PF: predicated region fallthrough
CT: control target
= control target key end

     0   :  { %8 = vsyncpa [#allocation5], 0  ;;  %s912_s0 = inlined_call_operand.hbm [shape: f32[2,512], index: 0, kind: input, shape index: {}]   ;;  %s913_s1 = inlined_call_operand.hbm [shape: f32[1,512], index: 1, kind: output, shape index: {0}]   ;;  %s914_s2 = inlined_call_operand.hbm [shape: f32[1,512], index: 2, kind: output, shape index: {1}]  }
   0x1   :  { %10 = vsyncpa [#allocation5 + $0x1], 0 }
   0x2   :  { %11 = vsyncpa [#allocation6], 0 }
   0x3   :  { %13 = vsyncpa [#allocation6 + $0x1], 0 }
   0x4   :  { %14 = vsyncpa [#allocation9], 0 }
   0x5   :  { %16 = vsyncpa [#allocation9 + $0x1], 0  ;;  %s710_s9 = smov 0   ;;  %s712_s10 = smov 0  }
   0x6   :  { %s714_s11 = smov 0   ;;  %s716_s12 = smov 0  }
   0x7   :  { %s718_s13 = smov 0   ;;  %s720_s14 = smov 0  }
   0x8 LB: > { %s451_s15 = sadd.s32 4294967295, %s688_s14   ;;  %s452_s16 = sadd.s32 4294967294, %s688_s14   ;;  %s688_s14 = sphi %s720_s14, %s22_s14   ;;  %s684_s13 = sphi %s718_s13, %s930_s13   ;;  %s680_s12 = sphi %s716_s12, %s929_s12   ;;  %s676_s11 = sphi %s714_s11, %s928_s11   ;;  %s672_s10 = sphi %s712_s10, %s927_s10   ;;  %s668_s9 = sphi %s710_s9, %s926_s9  }
   0x9   : > { %s34_s17 = sadd.s32 1, %s684_s13  ;;  %s43_s18 = sadd.s32 1, %s676_s11 }
   0xa   : > { %p36_p0 = scmp.ge.s32.totalorder %s34_s17, 2  ;;  %p50_p1 = scmp.ne.s32.totalorder %s676_s11, %s672_s10 }
   0xb   : > { %p51_p2 = scmp.eq.s32.totalorder %s688_s14, 0  ;;  %p56_p3 = scmp.ne.s32.totalorder %s672_s10, %s668_s9 }
   0xc   : > { %s932_s17 = smov (%p36_p0, %s34_s17), 0  ;;  %p57_p5 = scmp.eq.s32.totalorder %s451_s15, 0 }
   0xd   : > { %p751_p4 = por %p51_p2, %p50_p1  ;;  %s39_s20 = ssub.s32 %s684_s13, %s932_s17 }
   0xe   : > { %p80_p6 = scmp.eq.s32.totalorder %s451_s15, 1  ;;  %p41_p7 = scmp.eq.s32.totalorder %s39_s20, 0 }
   0xf   : > { %p757_p8 = por %p57_p5, %p56_p3  ;;  %p86_p10 = scmp.eq.s32.totalorder %s452_s16, 1 }
  0x10   : > { %p761_p9 = por %p80_p6, %p50_p1  ;;  %p492_p13 = scmp.lt.s32.totalorder %s688_s14, 2 }
  0x11   : > { %s766_s23 = scalar_select %p41_p7, %s676_s11, %s43_s18  }
  0x12   : > { %s918_s22 = scalar_select %p761_p9, 1, 0 }
  0x13   : > { %p768_p11 = por %p86_p10, %p56_p3  ;;  %s132_s25 = sand.u32 1, %s676_s11  }
  0x14   : > { %s455_s26 = sshll.u32 %s132_s25, 2  ;;  %s472_s27 = sshll.u32 %s684_s13, 6 }
  0x15   : > { %s919_s24 = scalar_select %p768_p11, 1, 0 }
  0x16   : > { %s779_s30 = scalar_lea.hbm %s912_s0, %s472_s27  ;;  %s136_s3 = scalar_lea.vmem [#allocation4], %s455_s26 }
  0x17   : > { %s146_s4 = sshll.u32 %s136_s3, 4  ;;  %p785_p0 = pnand %p492_p13, %p751_p4  ;;  %s781_s4 = int_to_ptr.vmem [resolvable:$true] %s146_s4 }
  0x18   : > { %s133_s6 = scalar_lea.sflag [#allocation5], %s132_s25  ;;  %s544_s7 = scalar_lea.hbm %s779_s30, 64 }
  0x19   : > { %p545_p3 = scmp.ne.s32.totalorder %s779_s30, %s544_s7  ;;  %p546_p5 = pneg %p785_p0 }
  0x1a   : > { %s549_s16 = scalar_lea.hbm %s912_s0, 128  ;;  %p550_p4 = scmp.lt.u32.totalorder %s779_s30, %s912_s0 }
  0x1b   : > { %p547_p6 = pnand %p546_p5, %p545_p3  ;;  %p551_p10 = scmp.lt.u32.totalorder %s549_s16, %s544_s7 }
  0x1c   : > { %p553_p12 = scmp.lt.u32.totalorder %s544_s7, %s779_s30 }
  0x1d   : > { %p548_p7 = pneg %p547_p6  ;;  %p552_p13 = por %p551_p10, %p550_p4 }
  0x1f   : > { %p554_p1 = por %p553_p12, %p552_p13 }
  0x21   : > { %p555_p2 = pnand %p554_p1, %p548_p7 }
  0x23   : > { %558 = shalt.err (!%p555_p2)
}
  0x24   : > { %s559_s20 = scalar_lea.vmem %s781_s4, 64  ;;  %s690_s25 = smov [#allocation4]  }
  0x25   : > { %p560_p3 = scmp.ne.s32.totalorder %s781_s4, %s559_s20  ;;  %s564_s26 = sshll.u32 %s690_s25, 4  ;;  %s565_s26 = int_to_ptr.vmem [resolvable:$false] %s564_s26 }
  0x26   : > { %s566_s27 = scalar_lea.vmem %s565_s26, 128  ;;  %p567_p9 = scmp.lt.s32.totalorder %s781_s4, %s565_s26 }
  0x27   : > { %p562_p6 = pnand %p560_p3, %p546_p5  ;;  %p568_p4 = scmp.lt.s32.totalorder %s566_s27, %s559_s20 }
  0x29   : > { %p563_p11 = pneg %p562_p6  ;;  %p569_p10 = por %p568_p4, %p567_p9 }
  0x2b   : > { %p570_p12 = pnand %p569_p10, %p563_p11 }
  0x2d   : > { %573 = shalt.err (!%p570_p12)
}
  0x2e   : > { %484 = dma.hbm_to_vmem [thread:$0]  (!%p785_p0), %s779_s30, 64, %s781_s4, %s133_s6  }
  0x2f   : > { %p921_p1 = scmp.lt.s32.totalorder %s688_s14, 3  ;;  %p922_p2 = scmp.ge.s32.totalorder %s688_s14, 1 }
  0x31   : > { %p152_p5 = pnand %p922_p2, %p921_p1 }
  0x32   : > { %s821_s28 = sand.u32 (!%p152_p5), 1, %s672_s10  }
  0x33   : > { %155 = sbr.rel (%p152_p5) target bundleno = 137 (0x89), region = 24  ;;  %s459_s29 = sshll.u32 (!%p152_p5), %s821_s28, 2 }
  0x34   : > { %s158_s3 = scalar_lea.sflag (!%p152_p5), [#allocation5], %s821_s28  ;;  %s161_s7 = scalar_lea.vmem (!%p152_p5), [#allocation4], %s459_s29 }
  0x3a   : > { %655 = dma.done.wait (%p757_p8), %s158_s3, 64  }
  0x3b   : > { %657 = vsyncadd (%p757_p8), %s158_s3, 4294967232  ;;  %v691_v0 = vmov 0.0   ;;  %v196_v1 = vld [vmem:[%s161_s7] sm:$0xf]  ;;  %vm221_vm0 = vcmask 1041408   ;;  %v242_v25 = vlaneseq  ;;  %s460_s21 = sshll.u32 %s821_s28, 1 }
  0x3c   : > { %194 = vst [vmem:[#allocation2] sm:$0xf] %v691_v0  ;;  %195 = vst [vmem:[#allocation3] sm:$0xf] %v691_v0  ;;  %v202_v4 = vmul.f32 %v196_v1, %v196_v1  ;;  %v692_v23 = vmov 1966171168  }
  0x3d   : > { %v240_v24 = vunpack.c.l.s4 %v692_v23  ;;  %v243_v35 = vshrl.u32 %v242_v25, 7  ;;  %s179_s30 = scalar_lea.vmem [#allocation7], %s460_s21  ;;  %s186_s5 = scalar_lea.vmem [#allocation8], %s460_s21  ;;  %vm256_vm1 = vcmp.lt.s32.totalorder %v242_v25, 256 }
  0x3e   : > { %s324_s4 = sshll.u32 %s179_s30, 4  ;;  %s338_s6 = sshll.u32 %s186_s5, 4  ;;  %s831_s4 = int_to_ptr.vmem [resolvable:$true] %s324_s4  ;;  %s833_s6 = int_to_ptr.vmem [resolvable:$true] %s338_s6 }
  0x3f   : > { %v241_v34 = vunpack.c.0.s8 %v240_v24  ;;  %s473_s8 = sshll.u32 %s680_s12, 5  ;;  %s305_s25 = scalar_lea.sflag [#allocation6], %s821_s28 }
  0x40   : > { %s838_s18 = scalar_lea.hbm %s913_s1, %s473_s8  ;;  %s843_s12 = scalar_lea.hbm %s914_s2, %s473_s8 }
  0x41   : > { %v244_v42 = vsub.s32 %v241_v34, %v243_v35  ;;  %s574_s26 = scalar_lea.vmem %s831_s4, 32  ;;  %p923_p9 = scmp.ne.s32.totalorder %s918_s22, 0 }
  0x42   : > { %p575_p8 = scmp.ne.s32.totalorder %s831_s4, %s574_s26  ;;  %s693_s27 = smov [#allocation7]  }
  0x43   : > { %v197_v2 = vld [vmem:[#allocation2] sm:$0xf]  ;;  %v201_v3 = vld [vmem:[#allocation3] sm:$0xf]  ;;  %s578_s29 = sshll.u32 %s693_s27, 4  ;;  %s579_s29 = int_to_ptr.vmem [resolvable:$false] %s578_s29 }
  0x44   : > { %v199_v5 = vadd.f32 %v197_v2, %v196_v1  ;;  %v204_v6 = vadd.f32 %v202_v4, %v201_v3  ;;  %p576_p11 = pnand %p575_p8, %p923_p9  ;;  %s580_s3 = scalar_lea.vmem %s579_s29, 64 }
  0x45   : > { %p581_p7 = scmp.lt.s32.totalorder %s831_s4, %s579_s29  ;;  %p582_p13 = scmp.lt.s32.totalorder %s580_s3, %s574_s26 }
  0x46   : > { %200 = vst [vmem:[#allocation2] sm:$0xf] %v199_v5  ;;  %205 = vst [vmem:[#allocation3] sm:$0xf] %v204_v6  ;;  %p577_p0 = pneg %p576_p11 }
  0x47   : > { %p583_p3 = por %p582_p13, %p581_p7 }
  0x49   : > { %p584_p6 = pnand %p583_p3, %p577_p0 }
  0x4d   : > { %v462_v7 = vld.sshfl [vmem:[#allocation2] sm:$0x33 pattern:$0x76325410] }
  0x4e   : > { %v218_v8 = vcombine.high %v462_v7, %v462_v7  ;;  %v222_v9 = vsel %vm221_vm0, %v462_v7, 0.0  ;;  %v463_v10 = vld.sshfl [vmem:[#allocation3] sm:$0x33 pattern:$0x76325410] }
  0x4f   : > { %v223_v11 = vrot.slane %v222_v9, 4  ;;  %v268_v12 = vcombine.high %v463_v10, %v463_v10  ;;  %v271_v13 = vsel %vm221_vm0, %v463_v10, 0.0 }
  0x50   : > { %v229_v14 = vsel %vm221_vm0, %v218_v8, 0.0  ;;  %v272_v15 = vrot.slane %v271_v13, 4 }
  0x51   : > { %v224_v16 = vadd.f32 %v223_v11, %v222_v9  ;;  %v230_v17 = vrot.slane %v229_v14, 4  ;;  %v278_v18 = vsel %vm221_vm0, %v268_v12, 0.0 }
  0x52   : > { %v273_v19 = vadd.f32 %v272_v15, %v271_v13  ;;  %v279_v20 = vrot.slane %v278_v18, 4 }
  0x53   : > { %v225_v21 = vrot.slane %v224_v16, 2  ;;  %v231_v22 = vadd.f32 %v230_v17, %v229_v14 }
  0x54   : > { %v274_v26 = vrot.slane %v273_v19, 2  ;;  %v280_v27 = vadd.f32 %v279_v20, %v278_v18 }
  0x55   : > { %v226_v28 = vadd.f32 %v225_v21, %v224_v16  ;;  %v232_v29 = vrot.slane %v231_v22, 2 }
  0x56   : > { %v275_v30 = vadd.f32 %v274_v26, %v273_v19  ;;  %v281_v31 = vrot.slane %v280_v27, 2 }
  0x57   : > { %v227_v32 = vrot.slane %v226_v28, 1  ;;  %v233_v33 = vadd.f32 %v232_v29, %v231_v22 }
  0x58   : > { %v276_v36 = vrot.slane %v275_v30, 1  ;;  %v282_v37 = vadd.f32 %v281_v31, %v280_v27 }
  0x59   : > { %v234_v38 = vrot.slane %v233_v33, 1  ;;  %v228_v40 = vadd.f32 %v227_v32, %v226_v28 }
  0x5a   : > { %v283_v39 = vrot.slane %v282_v37, 1  ;;  %v277_v43 = vadd.f32 %v276_v36, %v275_v30 }
  0x5b   : > { %v235_v41 = vadd.f32 %v234_v38, %v233_v33 }
  0x5c   : > { %v284_v44 = vadd.f32 %v283_v39, %v282_v37 }
  0x5d   : > { %v238_v45 = vcombine.low %v228_v40, %v235_v41 }
  0x5e   : > { %v287_v46 = vcombine.low %v277_v43, %v284_v44 }
  0x5f   : > { %v245_v47 = vrot.slane %v238_v45, %v244_v42 }
  0x60   : > { %v294_v48 = vrot.slane %v287_v46, %v244_v42 }
  0x61   : > { %v252_v49 = vrot.slane %v245_v47, %v244_v42 }
  0x62   : > { %v301_v50 = vrot.slane %v294_v48, %v244_v42 }
  0x63   : > { %258 = vst.msk [vmem:[%s179_s30] sm:$0x3] %vm256_vm1, %v252_v49 }
  0x64   : > { %303 = vst.msk [vmem:[%s186_s5] sm:$0x3] %vm256_vm1, %v301_v50 }
  0x65   : > { %587 = shalt.err (!%p584_p6)
}
  0x66   : > { %s588_s7 = scalar_lea.hbm %s838_s18, 32  ;;  %s592_s5 = scalar_lea.hbm %s913_s1, 64 }
  0x67   : > { %p589_p4 = scmp.ne.s32.totalorder %s838_s18, %s588_s7  ;;  %p593_p1 = scmp.lt.u32.totalorder %s838_s18, %s913_s1 }
  0x68   : > { %p594_p2 = scmp.lt.u32.totalorder %s592_s5, %s588_s7  ;;  %p596_p8 = scmp.lt.u32.totalorder %s588_s7, %s838_s18 }
  0x69   : > { %p590_p10 = pnand %p589_p4, %p923_p9 }
  0x6a   : > { %p595_p5 = por %p594_p2, %p593_p1 }
  0x6b   : > { %p591_p12 = pneg %p590_p10 }
  0x6c   : > { %p597_p11 = por %p596_p8, %p595_p5 }
  0x6e   : > { %p598_p0 = pnand %p597_p11, %p591_p12 }
  0x70   : > { %601 = shalt.err (!%p598_p0)
}
  0x71   : > { %477 = dma.vmem_to_hbm [thread:$0]  (%p923_p9), %s831_s4, 32, %s838_s18, %s305_s25  }
  0x72   : > { %s310_s16 = scalar_lea.sflag [#allocation9], %s821_s28  ;;  %s602_s19 = scalar_lea.vmem %s833_s6, 32 }
  0x73   : > { %p603_p7 = scmp.ne.s32.totalorder %s833_s6, %s602_s19  ;;  %s694_s20 = smov [#allocation8]  }
  0x74   : > { %s606_s26 = sshll.u32 %s694_s20, 4  ;;  %s607_s26 = int_to_ptr.vmem [resolvable:$false] %s606_s26 }
  0x75   : > { %p604_p13 = pnand %p603_p7, %p923_p9  ;;  %s608_s27 = scalar_lea.vmem %s607_s26, 64 }
  0x76   : > { %p609_p6 = scmp.lt.s32.totalorder %s833_s6, %s607_s26  ;;  %p610_p4 = scmp.lt.s32.totalorder %s608_s27, %s602_s19 }
  0x77   : > { %p605_p3 = pneg %p604_p13 }
  0x78   : > { %p611_p10 = por %p610_p4, %p609_p6 }
  0x7a   : > { %p612_p12 = pnand %p611_p10, %p605_p3 }
  0x7c   : > { %615 = shalt.err (!%p612_p12)
}
  0x7d   : > { %s616_s28 = scalar_lea.hbm %s843_s12, 32  ;;  %s620_s25 = scalar_lea.hbm %s914_s2, 64 }
  0x7e   : > { %p617_p1 = scmp.ne.s32.totalorder %s843_s12, %s616_s28  ;;  %p621_p8 = scmp.lt.u32.totalorder %s843_s12, %s914_s2 }
  0x7f   : > { %p622_p11 = scmp.lt.u32.totalorder %s620_s25, %s616_s28  ;;  %p624_p7 = scmp.lt.u32.totalorder %s616_s28, %s843_s12 }
  0x80   : > { %p618_p2 = pnand %p617_p1, %p923_p9 }
  0x81   : > { %p623_p0 = por %p622_p11, %p621_p8 }
  0x82   : > { %p619_p5 = pneg %p618_p2 }
  0x83   : > { %p625_p13 = por %p624_p7, %p623_p0 }
  0x85   : > { %p626_p3 = pnand %p625_p13, %p619_p5 }
  0x87   : > { %629 = shalt.err (!%p626_p3)
}
  0x88   : > { %478 = dma.vmem_to_hbm [thread:$0]  (%p923_p9), %s833_s6, 32, %s843_s12, %s310_s16  }
  0x89 PF: > { %s350_s7 = sand.u32 1, %s668_s9   ;;  %p924_p6 = scmp.ne.s32.totalorder %s919_s24, 0 }
  0x8a   : > { %p925_p4 = scmp.ge.s32.totalorder %s688_s14, 2  ;;  %s351_s21 = scalar_lea.sflag [#allocation6], %s350_s7 }
  0x8c   : > { %p486_p10 = pnand %p925_p4, %p924_p6 }
  0x8e   : > { %659 = dma.done.wait (!%p486_p10), %s351_s21, 32  }
  0x8f   : > { %661 = vsyncadd (!%p486_p10), %s351_s21, 4294967264  ;;  %s360_s30 = scalar_lea.sflag [#allocation9], %s350_s7 }
  0x90   : > { %663 = dma.done.wait (!%p486_p10), %s360_s30, 32  }
  0x91   : > { %665 = vsyncadd (!%p486_p10), %s360_s30, 4294967264  ;;  %s22_s14 = sadd.s32 1, %s688_s14   ;;  %s926_s9 = smov %s672_s10 }
  0x92   : > { %p19_p12 = scmp.ge.s32.totalorder %s22_s14, 4   ;;  %s927_s10 = smov %s676_s11 }
  0x93   : > { %s928_s11 = smov %s766_s23  ;;  %s929_s12 = smov %s684_s13 }
  0x94   : > { %s930_s13 = smov %s932_s17  ;;  %21 = sbr.rel (!%p19_p12) target bundleno = 8 (0x8), region = 94 }
  0x9b   :  { %365 = vsyncpa [#allocation5], 1 }
  0x9c   :  { %367 = vsyncpa [#allocation5 + $0x1], 1 }
  0x9d   :  { %368 = vsyncpa [#allocation6], 1 }
  0x9e   :  { %370 = vsyncpa [#allocation6 + $0x1], 1 }
  0x9f   :  { %371 = vsyncpa [#allocation9], 1 }
  0xa0   :  { %373 = vsyncpa [#allocation9 + $0x1], 1 }

</bundles_post_ra>
